<compile_context>
chip_gen: v7x
topology: tpu7x:2x2x1
jax: 0.10.0
libtpu: 0.0.40
codegen_flags: <defaults>
</compile_context>

<pallas_src>
import math
import functools

import jax
import jax.numpy as jnp
from jax.experimental import pallas as pl
from jax.experimental.pallas import tpu as pltpu


def _round_up(n, m):
    return (n + m - 1) // m * m


def _vmem_limit_bytes():
    """~75% of per-core VMEM: ~48 MiB on v7x (64 MiB), ~96 MiB on v5e/v6e."""
    cap = 64 * 1024 * 1024
    try:
        info = pltpu.get_tpu_info()
        cap = int(getattr(info, "vmem_capacity_bytes", cap)) or cap
    except Exception:
        pass
    return min(cap * 3 // 4, 112 * 1024 * 1024)


def _pick_class_tile(dim_out, block_c):
    """Lane-dense 128-aligned class tile; divides dim_out when possible so
    c_pad == dim_out and the output slice along classes is a no-op."""
    block_c = max(128, _round_up(block_c, 128))
    if dim_out % 128 == 0:
        best, t = 128, 128
        while t <= min(block_c, dim_out):
            if dim_out % t == 0:
                best = t
            t += 128
        return best
    return min(block_c, _round_up(dim_out, 128))


def arcface_kernel(x_ref, w_ref, invx_ref, invw_ref, y_ref, o_ref, *,
                   s, cos_m, sin_m, th, mm, eps, easy_margin, tile_c, test):
    # Straight MXU feed: (TB, K) x (K, TC), K-major weight (pre-transposed).
    raw = jax.lax.dot_general(
        x_ref[...], w_ref[...],
        dimension_numbers=(((1,), (0,)), ((), ())),
        preferred_element_type=jnp.float32)               # (TB, TC) f32

    # cosine = <x, w> / (||x|| * ||w||) via cheap post-matmul scaling.
    cosine = raw * invx_ref[...] * invw_ref[...]          # (TB,1)*(1,TC) bcast
    cosine = jnp.clip(cosine, -1.0 + eps, 1.0 - eps)

    if test:   # test=True path of the PyTorch forward: clamped cosine only.
        o_ref[...] = cosine.astype(o_ref.dtype)
        return

    # cosine is clamped to (-1+eps, 1-eps) so 1.000000001 - cos^2 is already
    # in (~1e-9, 1.000000001]; the reference clamp(0,1) is redundant (saves
    # VALU ops in the epilogue; |diff| <= ~5e-10 on sine).
    sine = jnp.sqrt(1.000000001 - cosine * cosine)
    phi = cosine * cos_m - sine * sin_m
    if easy_margin:
        phi = jnp.where(cosine > 0.0, phi, cosine)
    else:
        phi = jnp.where(cosine > th, phi, cosine - mm)

    # One-hot scatter -> single select against the GLOBAL class index
    # (class-tile axis is the OUTER grid axis, program_id(0)).
    cls = pl.program_id(0) * tile_c + jax.lax.broadcasted_iota(
        jnp.int32, cosine.shape, 1)
    out = jnp.where(cls == y_ref[...], phi, cosine) * s
    o_ref[...] = out.astype(o_ref.dtype)


class ArcFaceMetricPallas:
    def __init__(self, dim_in, dim_out, s=30.0, m=0.5, easy_margin=False,
                 key=None, block_b=256, block_c=512, use_bf16=True,
                 out_dtype=jnp.float32):
        self.dim_in = dim_in
        self.dim_out = dim_out
        self.s = float(s)
        self.m = float(m)
        self.easy_margin = easy_margin
        self.eps = 1e-12
        self.cos_m = math.cos(m)
        self.sin_m = math.sin(m)
        self.th = math.cos(math.pi - m)
        self.mm = math.sin(math.pi - m) * m
        self.block_b = block_b
        self._compute_dtype = jnp.bfloat16 if use_bf16 else jnp.float32
        self._out_dtype = out_dtype          # bf16 halves logit writeback
        self._vmem_limit = _vmem_limit_bytes()

        # xavier_uniform_ for a (dim_out, dim_in) weight.
        if key is None:
            key = jax.random.PRNGKey(0)
        bound = math.sqrt(6.0 / (dim_in + dim_out))
        w = jax.random.uniform(key, (dim_out, dim_in), dtype=jnp.float32,
                               minval=-bound, maxval=bound)
        self.layer = w                                   # f32 master copy

        # Pad K to an MXU-friendly multiple (zero columns don't change dots).
        k_align = 256 if dim_in >= 256 else 128
        self.k_pad = _round_up(dim_in, k_align)

        # Class tile (lane-dense, 128-aligned, divides dim_out when possible).
        self.tc = _pick_class_tile(dim_out, block_c)
        self.c_pad = _round_up(dim_out, self.tc)

        # Precompute 1/max(||w_j||, eps) once (weight is a fixed parameter).
        ssq = jnp.sum(w * w, axis=-1)
        inv_w = jax.lax.rsqrt(jnp.maximum(ssq, self.eps * self.eps))
        self._inv_w_row = jnp.pad(
            inv_w, (0, self.c_pad - dim_out)).reshape(1, self.c_pad)

        # Weight pre-transposed to K-major (k_pad, c_pad): straight
        # (TB,K)x(K,TC) MXU feed, no per-tile XLU transpose in the kernel.
        w_pad = jnp.pad(w, ((0, self.c_pad - dim_out),
                            (0, self.k_pad - dim_in)))
        self._w_dev = jnp.transpose(w_pad).astype(self._compute_dtype)

    def __call__(self, x, y, test=False):
        B = x.shape[0]
        assert x.shape[1] == self.dim_in
        # bf16 packs 2 rows per sublane -> 16-align the batch tile.
        b_align = 16 if self._compute_dtype == jnp.bfloat16 else 8
        tb = min(self.block_b, _round_up(B, b_align))
        b_pad = _round_up(B, tb)
        tc = self.tc

        xf = x.astype(jnp.float32)
        inv_x = jax.lax.rsqrt(jnp.maximum(
            jnp.sum(xf * xf, axis=-1, keepdims=True), self.eps * self.eps))
        x_dev = xf.astype(self._compute_dtype)
        y2d = jnp.asarray(y).reshape(-1, 1).astype(jnp.int32)
        if b_pad != B or self.k_pad != self.dim_in:
            x_dev = jnp.pad(x_dev, ((0, b_pad - B),
                                    (0, self.k_pad - self.dim_in)))
        if b_pad != B:
            inv_x = jnp.pad(inv_x, ((0, b_pad - B), (0, 0)))
            y2d = jnp.pad(y2d, ((0, b_pad - B), (0, 0)), constant_values=-1)

        # Class axis OUTERMOST: the weight tile is resident across the inner
        # batch loop (read from HBM once per call); x / inv_x / labels stream.
        grid = (self.c_pad // tc, b_pad // tb)
        kernel = functools.partial(
            arcface_kernel, s=self.s, cos_m=self.cos_m, sin_m=self.sin_m,
            th=self.th, mm=self.mm, eps=self.eps,
            easy_margin=self.easy_margin, tile_c=tc, test=test)

        # TODO(synk): if xprof shows the streamed x DMA still exposed for very
        # small K, add pipeline_mode=pl.Buffered(3) on the x BlockSpec.
        out = pl.pallas_call(
            kernel,
            out_shape=jax.ShapeDtypeStruct((b_pad, self.c_pad),
                                           self._out_dtype),
            grid=grid,
            in_specs=[
                pl.BlockSpec((tb, self.k_pad), lambda j, i: (i, 0)),   # x
                pl.BlockSpec((self.k_pad, tc), lambda j, i: (0, j)),   # W^T
                pl.BlockSpec((tb, 1), lambda j, i: (i, 0)),            # 1/||x||
                pl.BlockSpec((1, tc), lambda j, i: (0, j)),            # 1/||w||
                pl.BlockSpec((tb, 1), lambda j, i: (i, 0)),            # labels
            ],
            out_specs=pl.BlockSpec((tb, tc), lambda j, i: (i, j)),
            compiler_params=pltpu.CompilerParams(
                dimension_semantics=("parallel", "parallel"),
                vmem_limit_bytes=self._vmem_limit),
        )(x_dev, self._w_dev, inv_x, self._inv_w_row, y2d)

        if b_pad == B and self.c_pad == self.dim_out:
            return out                     # no-op epilogue, no extra HBM pass
        return out[:B, :self.dim_out]


def _reference(module, x, y, test=False):
    """Plain-JAX ArcFace forward mirroring the PyTorch math (post-matmul
    L2 scaling is mathematically identical to normalize-then-matmul)."""
    eps = module.eps
    xf = x.astype(jnp.float32)
    w = module.layer
    inv_x = jax.lax.rsqrt(jnp.maximum(
        jnp.sum(xf * xf, axis=-1, keepdims=True), eps * eps))
    inv_w = jax.lax.rsqrt(jnp.maximum(jnp.sum(w * w, axis=-1), eps * eps))
    raw = jax.lax.dot_general(
        xf.astype(module._compute_dtype), w.astype(module._compute_dtype),
        dimension_numbers=(((1,), (1,)), ((), ())),
        preferred_element_type=jnp.float32)
    cosine = jnp.clip(raw * inv_x * inv_w[None, :], -1.0 + eps, 1.0 - eps)
    if test:
        return cosine, cosine
    sine = jnp.sqrt(jnp.clip(1.000000001 - cosine ** 2, 0.0, 1.0))
    phi = cosine * module.cos_m - sine * module.sin_m
    if module.easy_margin:
        phi = jnp.where(cosine > 0.0, phi, cosine)
    else:
        phi = jnp.where(cosine > module.th, phi, cosine - module.mm)
    one_hot = jax.nn.one_hot(y, module.dim_out, dtype=jnp.float32)
    out = (one_hot * phi + (1.0 - one_hot) * cosine) * module.s
    return out, cosine


def _assert_close(out, ref, cos_ref, th, atol):
    # Exclude a tiny band around the margin branch boundary (where any
    # last-ulp difference in cosine legitimately flips the select).
    safe = jnp.abs(cos_ref - th) > 1e-3
    diff = jnp.where(safe, jnp.abs(out.astype(jnp.float32) - ref), 0.0)
    assert bool(jnp.all(diff <= atol)), "mismatch vs reference"
    assert float(jnp.mean(safe)) > 0.9


if __name__ == "__main__":
    key = jax.random.PRNGKey(0)
    kx, ky, kw = jax.random.split(key, 3)

    # Case 1: bf16 compute, dim_out a multiple of 128 (class slice is a
    # no-op); small tiles so the (class, batch) grid is 3 x 2.
    B, dim_in, dim_out = 32, 32, 384
    x = jax.random.normal(kx, (B, dim_in), dtype=jnp.float32)
    y = jax.random.randint(ky, (B,), 0, dim_out, dtype=jnp.int32)

    mod_bf16 = ArcFaceMetricPallas(dim_in, dim_out, key=kw,
                                   block_b=16, block_c=128, use_bf16=True)
    out_bf16 = mod_bf16(x, y)
    jax.block_until_ready(out_bf16)
    assert out_bf16.shape == (B, dim_out)
    ref_bf16, cos_bf16 = _reference(mod_bf16, x, y)
    _assert_close(out_bf16, ref_bf16, cos_bf16, mod_bf16.th, atol=2e-3)

    # bf16 output dtype option (halves logit writeback); smoke test.
    mod_half_out = ArcFaceMetricPallas(dim_in, dim_out, key=kw,
                                       block_b=16, block_c=128,
                                       use_bf16=True, out_dtype=jnp.bfloat16)
    out_half = mod_half_out(x, y)
    jax.block_until_ready(out_half)
    assert out_half.dtype == jnp.bfloat16 and out_half.shape == (B, dim_out)

    # Case 2: f32 compute, dim_out NOT 128-aligned (padding path), grid 2 x 2.
    B2, dim_out2 = 16, 200
    x2 = jax.random.normal(kx, (B2, dim_in), dtype=jnp.float32)
    y2 = jax.random.randint(ky, (B2,), 0, dim_out2, dtype=jnp.int32)
    mod_f32 = ArcFaceMetricPallas(dim_in, dim_out2, key=kw,
                                  block_b=8, block_c=128, use_bf16=False)
    out_f32 = mod_f32(x2, y2)
    jax.block_until_ready(out_f32)
    assert out_f32.shape == (B2, dim_out2)
    ref_f32, cos_f32 = _reference(mod_f32, x2, y2)
    _assert_close(out_f32, ref_f32, cos_f32, mod_f32.th, atol=1e-3)

    # test=True path: clamped cosine only.
    out_test = mod_f32(x2, y2, test=True)
    jax.block_until_ready(out_test)
    ref_test, _ = _reference(mod_f32, x2, y2, test=True)
    assert bool(jnp.all(jnp.abs(out_test - ref_test) <= 1e-3))

    print("KERNEL_OK")
</pallas_src>

<mosaic_0001>
module attributes {stable_mosaic.version = 11 : i64} {
  func.func @arcface_kernel(%arg0: i32, %arg1: i32, %arg2: memref<16x128xbf16, #tpu.memory_space<vmem>>, %arg3: memref<128x128xbf16, #tpu.memory_space<vmem>>, %arg4: memref<16x1xf32, #tpu.memory_space<vmem>>, %arg5: memref<1x128xf32, #tpu.memory_space<vmem>>, %arg6: memref<16x1xi32, #tpu.memory_space<vmem>>, %arg7: memref<16x128xf32, #tpu.memory_space<vmem>>) attributes {dimension_semantics = [#tpu.dimension_semantics<parallel>, #tpu.dimension_semantics<parallel>], iteration_bounds = array<i64: 3, 2>, scalar_prefetch = 0 : i64, scratch_operands = 0 : i64, tpu.core_type = #tpu.core_type<tc>, window_params = [{transform_indices = @transform_0, window_bounds = array<i64: 16, 128>}, {transform_indices = @transform_1, window_bounds = array<i64: 128, 128>}, {transform_indices = @transform_2, window_bounds = array<i64: 16, 1>}, {transform_indices = @transform_3, window_bounds = array<i64: 1, 128>}, {transform_indices = @transform_4, window_bounds = array<i64: 16, 1>}, {transform_indices = @transform_5, window_bounds = array<i64: 16, 128>}]} {
    %c0 = arith.constant 0 : index
    %c0_0 = arith.constant 0 : index
    %0 = vector.load %arg2[%c0, %c0_0] : memref<16x128xbf16, #tpu.memory_space<vmem>>, vector<16x128xbf16>
    %c0_1 = arith.constant 0 : index
    %c0_2 = arith.constant 0 : index
    %1 = vector.load %arg3[%c0_1, %c0_2] : memref<128x128xbf16, #tpu.memory_space<vmem>>, vector<128x128xbf16>
    %cst = arith.constant dense<0.000000e+00> : vector<16x128xf32>
    %2 = tpu.matmul %0, %1, %cst {dimension_numbers = #tpu.dot_dimension_numbers<[1], [0], [0], [1], [0, 0, 1, 1], [], []>} : vector<16x128xbf16>, vector<128x128xbf16>, vector<16x128xf32> -> vector<16x128xf32>
    %c0_3 = arith.constant 0 : index
    %c0_4 = arith.constant 0 : index
    %3 = vector.load %arg4[%c0_3, %c0_4] : memref<16x1xf32, #tpu.memory_space<vmem>>, vector<16x1xf32>
    %4 = vector.broadcast %3 : vector<16x1xf32> to vector<16x128xf32>
    %5 = arith.mulf %2, %4 : vector<16x128xf32>
    %c0_5 = arith.constant 0 : index
    %c0_6 = arith.constant 0 : index
    %6 = vector.load %arg5[%c0_5, %c0_6] : memref<1x128xf32, #tpu.memory_space<vmem>>, vector<1x128xf32>
    %7 = vector.broadcast %6 : vector<1x128xf32> to vector<16x128xf32>
    %8 = arith.mulf %5, %7 : vector<16x128xf32>
    %cst_7 = arith.constant -1.000000e+00 : f32
    %cst_8 = arith.constant 1.000000e+00 : f32
    %9 = vector.broadcast %cst_7 : f32 to vector<16x128xf32>
    %10 = arith.maximumf %9, %8 : vector<16x128xf32>
    %11 = vector.broadcast %cst_8 : f32 to vector<16x128xf32>
    %12 = arith.minimumf %11, %10 : vector<16x128xf32>
    %13 = arith.mulf %12, %12 : vector<16x128xf32>
    %cst_9 = arith.constant 1.000000e+00 : f32
    %14 = vector.broadcast %cst_9 : f32 to vector<16x128xf32>
    %15 = arith.subf %14, %13 : vector<16x128xf32>
    %16 = math.sqrt %15 : vector<16x128xf32>
    %cst_10 = arith.constant 0.87758255 : f32
    %17 = vector.broadcast %cst_10 : f32 to vector<16x128xf32>
    %18 = arith.mulf %12, %17 : vector<16x128xf32>
    %cst_11 = arith.constant 0.47942555 : f32
    %19 = vector.broadcast %cst_11 : f32 to vector<16x128xf32>
    %20 = arith.mulf %16, %19 : vector<16x128xf32>
    %21 = arith.subf %18, %20 : vector<16x128xf32>
    %cst_12 = arith.constant -0.87758255 : f32
    %22 = vector.broadcast %cst_12 : f32 to vector<16x128xf32>
    %23 = arith.cmpf ogt, %12, %22 : vector<16x128xf32>
    %cst_13 = arith.constant 0.239712775 : f32
    %24 = vector.broadcast %cst_13 : f32 to vector<16x128xf32>
    %25 = arith.subf %12, %24 : vector<16x128xf32>
    %26 = arith.select %23, %21, %25 : vector<16x128xi1>, vector<16x128xf32>
    %c128_i32 = arith.constant 128 : i32
    %27 = arith.muli %arg0, %c128_i32 : i32
    %28 = tpu.iota {dimensions = array<i32: 1>} : vector<16x128xi32>
    %29 = vector.broadcast %27 : i32 to vector<16x128xi32>
    %30 = arith.addi %29, %28 : vector<16x128xi32>
    %c0_14 = arith.constant 0 : index
    %c0_15 = arith.constant 0 : index
    %31 = vector.load %arg6[%c0_14, %c0_15] : memref<16x1xi32, #tpu.memory_space<vmem>>, vector<16x1xi32>
    %32 = vector.broadcast %31 : vector<16x1xi32> to vector<16x128xi32>
    %33 = arith.cmpi eq, %30, %32 : vector<16x128xi32>
    %34 = arith.select %33, %26, %12 : vector<16x128xi1>, vector<16x128xf32>
    %cst_16 = arith.constant 3.000000e+01 : f32
    %35 = vector.broadcast %cst_16 : f32 to vector<16x128xf32>
    %36 = arith.mulf %34, %35 : vector<16x128xf32>
    %c0_17 = arith.constant 0 : index
    %c0_18 = arith.constant 0 : index
    %37 = vector.load %arg7[%c0_17, %c0_18] : memref<16x128xf32, #tpu.memory_space<vmem>>, vector<16x128xf32>
    tpu.vector_store %arg7[%c0_17, %c0_18], %36 {strides = array<i32>} : memref<16x128xf32, #tpu.memory_space<vmem>>, vector<16x128xf32>,
    return
  }
  func.func @transform_0(%arg0: i32, %arg1: i32) -> (i32, i32) {
    %c0_i32 = arith.constant 0 : i32
    %c0_i32_0 = arith.constant 0 : i32
    return %arg1, %c0_i32 : i32, i32
  }
  func.func @transform_1(%arg0: i32, %arg1: i32) -> (i32, i32) {
    %c0_i32 = arith.constant 0 : i32
    %c0_i32_0 = arith.constant 0 : i32
    return %c0_i32, %arg0 : i32, i32
  }
  func.func @transform_2(%arg0: i32, %arg1: i32) -> (i32, i32) {
    %c0_i32 = arith.constant 0 : i32
    %c0_i32_0 = arith.constant 0 : i32
    return %arg1, %c0_i32 : i32, i32
  }
  func.func @transform_3(%arg0: i32, %arg1: i32) -> (i32, i32) {
    %c0_i32 = arith.constant 0 : i32
    %c0_i32_0 = arith.constant 0 : i32
    return %c0_i32, %arg0 : i32, i32
  }
  func.func @transform_4(%arg0: i32, %arg1: i32) -> (i32, i32) {
    %c0_i32 = arith.constant 0 : i32
    %c0_i32_0 = arith.constant 0 : i32
    return %arg1, %c0_i32 : i32, i32
  }
  func.func @transform_5(%arg0: i32, %arg1: i32) -> (i32, i32) {
    %c0_i32 = arith.constant 0 : i32
    return %arg1, %arg0 : i32, i32
  }
}

</mosaic_0001>

<bundles_post_ra>
// kernel: tpu_custom_call.1
= control target key start
LH: loop header
LB: loop body
LE: loop exit
PB: predicated region body
PF: predicated region fallthrough
CT: control target
= control target key end

     0   :  { %s1313_s0 = inlined_call_operand.vmem [shape: bf16[32,128], index: 0, kind: input, shape index: {}]   ;;  %s1314_s1 = inlined_call_operand.hbm [shape: bf16[128,384], index: 1, kind: input, shape index: {}]   ;;  %s1315_s2 = inlined_call_operand.vmem [shape: f32[32,1], index: 2, kind: input, shape index: {}]   ;;  %s1316_s3 = inlined_call_operand.vmem [shape: f32[1,384], index: 3, kind: input, shape index: {}]   ;;  %s1317_s4 = inlined_call_operand.vmem [shape: s32[32,1], index: 4, kind: input, shape index: {}]   ;;  %s1318_s5 = inlined_call_operand.hbm [shape: f32[32,384], index: 5, kind: output, shape index: {}]  }
   0x1   :  { %1323 = sst [smem:[#allocation11_spill]] %s1314_s1 }
   0x2   :  { %10 = vsyncpa [#allocation3], 0 }
   0x3   :  { %12 = vsyncpa [#allocation3 + $0x1], 0 }
   0x4   :  { %13 = vsyncpa [#allocation4], 0 }
   0x5   :  { %15 = vsyncpa [#allocation4 + $0x1], 0  ;;  %s1063_s18 = smov 0   ;;  %s1065_s19 = smov 0  }
   0x6   :  { %s1067_s20 = smov 0   ;;  %s1069_s21 = smov 0  }
   0x7   :  { %s1071_s22 = smov 0   ;;  %s1073_s23 = smov 0  }
   0x8   :  { %s1075_s24 = smov 0   ;;  %s1077_s25 = smov 0  }
   0x9   :  { %s1079_s26 = smov 0   ;;  %s1081_s27 = smov 0  }
   0xa   :  { %s1083_s28 = smov 0  }
   0xb LB: > { %1324 = sst [smem:[#allocation8_spill]] %s1016_s27  ;;  %s676_s29 = sadd.s32 4294967295, %s1020_s28   ;;  %s1020_s28 = sphi %s1083_s28, %s21_s28   ;;  %s1016_s27 = sphi %s1081_s27, %s1337_s27   ;;  %s1012_s26 = sphi %s1079_s26, %s1345_s26   ;;  %s1008_s25 = sphi %s1077_s25, %s1335_s25   ;;  %s1004_s24 = sphi %s1075_s24, %s1344_s24   ;;  %s1000_s23 = sphi %s1073_s23, %s1343_s23   ;;  %s996_s22 = sphi %s1071_s22, %s1342_s22   ;;  %s992_s21 = sphi %s1069_s21, %s1341_s21   ;;  %s988_s20 = sphi %s1067_s20, %s1340_s20   ;;  %s984_s19 = sphi %s1065_s19, %s1339_s19   ;;  %s980_s18 = sphi %s1063_s18, %s1338_s18  }
   0xc   : > { %s677_s30 = sadd.s32 4294967294, %s1020_s28   ;;  %s30_s6 = sadd.s32 1, %s1012_s26 }
   0xd   : > { %s33_s7 = sadd.s32 1, %s1016_s27  ;;  %p31_p0 = scmp.ge.s32.totalorder %s30_s6, 2 }
   0xe   : > { %s66_s8 = sadd.s32 1, %s1000_s23  ;;  %p73_p1 = scmp.ne.s32.totalorder %s1000_s23, %s996_s22 }
   0xf   : > { %p74_p2 = scmp.eq.s32.totalorder %s1020_s28, 0  ;;  %s1347_s6 = smov (%p31_p0, %s30_s6), 0 }
  0x10   : > { %1325 = sst [smem:[#allocation9_spill]] %s1347_s6  ;;  %s1349_s7 = smov (!%p31_p0, %s33_s7), %s1016_s27 }
  0x11   : > { %p1127_p3 = por %p74_p2, %p73_p1  ;;  %p79_p4 = scmp.ne.s32.totalorder %s996_s22, %s992_s21 }
  0x12   : > { %p35_p5 = scmp.ge.s32.totalorder %s1349_s7, 3  ;;  %p80_p6 = scmp.eq.s32.totalorder %s676_s29, 0 }
  0x13   : > { %s167_s10 = ssub.s32 %s1012_s26, %s1347_s6  ;;  %s172_s11 = sadd.s32 1, %s988_s20 }
  0x14   : > { %s1351_s7 = smov (%p35_p5, %s1349_s7), 0  ;;  %p1137_p7 = por %p80_p6, %p79_p4 }
  0x15   : > { %1327 = sst [smem:[#allocation10_spill]] %s1351_s7  ;;  %p182_p8 = scmp.ne.s32.totalorder %s988_s20, %s984_s19 }
  0x16   : > { %s63_s13 = ssub.s32 %s1016_s27, %s1351_s7  ;;  %p183_p9 = scmp.eq.s32.totalorder %s676_s29, 5 }
  0x17   : > { %p64_p10 = scmp.eq.s32.totalorder %s63_s13, 0  ;;  %s169_s14 = sor.u32 %s167_s10, %s63_s13 }
  0x18   : > { %p170_p11 = scmp.eq.s32.totalorder %s169_s14, 0  ;;  %p1145_p12 = por %p183_p9, %p182_p8 }
  0x19   : > { %s1150_s16 = scalar_select %p64_p10, %s1000_s23, %s66_s8  }
  0x1a   : > { %s1329_s15 = scalar_select %p1145_p12, 1, 0 }
  0x1b   : > { %s1153_s17 = scalar_select %p170_p11, %s988_s20, %s172_s11  }
  0x1c   : > { %p188_p13 = scmp.ne.s32.totalorder %s984_s19, %s980_s18  ;;  %p189_p0 = scmp.eq.s32.totalorder %s677_s30, 5 }
  0x1d   : > { %p754_p1 = scmp.lt.s32.totalorder %s1020_s28, 6  ;;  %s218_s29 = sand.u32 1, %s1000_s23  }
  0x1e   : > { %p1158_p2 = por %p189_p0, %p188_p13  ;;  %s680_s7 = sshll.u32 %s218_s29, 6 }
  0x1f   : > { %s681_s10 = sshll.u32 %s1016_s27, 6  ;;  %s1331_s1 = sld [smem:[#allocation11_spill]] }
  0x20   : > { %s1330_s21 = scalar_select %p1158_p2, 1, 0 }
  0x21   : > { %s222_s8 = scalar_lea.vmem [#allocation2], %s680_s7  ;;  %p1173_p4 = pnand %p754_p1, %p1127_p3 }
  0x22   : > { %s228_s11 = sshll.u32 %s222_s8, 4  ;;  %s1177_s27 = scalar_lea.sflag [#allocation3], %s218_s29  ;;  %s1169_s11 = int_to_ptr.vmem [resolvable:$true] %s228_s11 }
  0x23   : > { %p870_p6 = pneg %p1173_p4 }
  0x25   : > { %s1167_s6 = scalar_lea.hbm %s1331_s1, %s681_s10  ;;  %s873_s9 = scalar_lea.hbm %s1331_s1, 3072 }
  0x26   : > { %s868_s13 = scalar_lea.hbm %s1167_s6, 1024  ;;  %p874_p3 = scmp.lt.u32.totalorder %s1167_s6, %s1331_s1 }
  0x27   : > { %p869_p5 = scmp.ne.s32.totalorder %s1167_s6, %s868_s13  ;;  %p875_p10 = scmp.lt.u32.totalorder %s873_s9, %s868_s13 }
  0x28   : > { %p877_p13 = scmp.lt.u32.totalorder %s868_s13, %s1167_s6 }
  0x29   : > { %p871_p8 = pnand %p870_p6, %p869_p5  ;;  %p876_p11 = por %p875_p10, %p874_p3 }
  0x2b   : > { %p872_p9 = pneg %p871_p8  ;;  %p878_p0 = por %p877_p13, %p876_p11 }
  0x2d   : > { %p879_p1 = pnand %p878_p0, %p872_p9 }
  0x2f   : > { %882 = shalt.err (!%p879_p1)
}
  0x30   : > { %s883_s29 = scalar_lea.vmem %s1169_s11, 1024  ;;  %s1022_s7 = smov [#allocation2]  }
  0x31   : > { %p884_p5 = scmp.ne.s32.totalorder %s1169_s11, %s883_s29  ;;  %s888_s10 = sshll.u32 %s1022_s7, 4  ;;  %s889_s10 = int_to_ptr.vmem [resolvable:$false] %s888_s10 }
  0x32   : > { %s890_s14 = scalar_lea.vmem %s889_s10, 2048  ;;  %p891_p12 = scmp.lt.s32.totalorder %s1169_s11, %s889_s10 }
  0x33   : > { %p886_p8 = pnand %p884_p5, %p870_p6  ;;  %p892_p3 = scmp.lt.s32.totalorder %s890_s14, %s883_s29 }
  0x35   : > { %p887_p2 = pneg %p886_p8  ;;  %p893_p10 = por %p892_p3, %p891_p12 }
  0x37   : > { %p894_p11 = pnand %p893_p10, %p887_p2 }
  0x39   : > { %897 = shalt.err (!%p894_p11)
}
  0x3a   : > { %s1023_s13 = smov 192   ;;  %s1024_s9 = smov 64  }
  0x3b   : > { %s1025_s8 = smov 4   ;;  %p682_p6 = scmp.ge.s32.totalorder %s1020_s28, 1 }
  0x3c   : > { %749 = dma.hbm_to_vmem [thread:$0]  (!%p1173_p4), %s1167_s6, 1024, %s1169_s11, %s1177_s27, %s1023_s13, %s1024_s9, %s1025_s8  }
  0x3d   : > { %p260_p9 = scmp.lt.s32.totalorder %s1020_s28, 7 }
  0x3f   : > { %p261_p13 = pnand %p682_p6, %p260_p9 }
  0x40   : > { %s266_s29 = sand.u32 (!%p261_p13), 1, %s996_s22  }
  0x41   : > { %264 = sbr.rel (%p261_p13) target bundleno = 370 (0x172), region = 40  ;;  %s683_s7 = sshll.u32 (!%p261_p13), %s266_s29, 6 }
  0x42   : > { %s267_s10 = scalar_lea.sflag (!%p261_p13), [#allocation3], %s266_s29  ;;  %s1208_s14 = scalar_lea.vmem (!%p261_p13), [#allocation2], %s683_s7 }
  0x48   : > { %971 = dma.done.wait (%p1137_p7), %s267_s10, 1024  }
  0x49   : > { %973 = vsyncadd (%p1137_p7), %s267_s10, 4294966272  ;;  %s685_s27 = sshll.u32 %s1004_s24, 1  ;;  %v1026_v0 = vmov 0.0   ;;  %vm1027_vm0 = vmmov 0   ;;  %v1028_v1 = vmov 0   ;;  %v855_v2 = vld [vmem:[%s1208_s14] sm:$0xff]   ;;  %v509_v32 = vlaneseq }
  0x4a   : > { %721 = vmatprep.subr.bf16.mxu0 %v1026_v0  ;;  %737 = vmatprep.mubr.msk.bf16.mxu0 %vm1027_vm0, %v1026_v0  ;;  %p316_p12 = scmp.lt.s32.totalorder %s685_s27, 3  ;;  %v856_v3 = vld [vmem:[%s1208_s14 + $0x8] sm:$0xff]   ;;  %v857_v4 = vld [vmem:[%s1208_s14 + $0x10] sm:$0xff]   ;;  %v858_v7 = vld [vmem:[%s1208_s14 + $0x18] sm:$0xff]   ;;  %p327_p7 = scmp.lt.s32.totalorder %s1008_s25, 2 }
  0x4b   : > { %853 = vset.pattern.permute.xlu0 %v1028_v1  ;;  %854 = vset.pattern.permute.xlu1 %v1028_v1  ;;  %v859_v10 = vld [vmem:[%s1208_s14 + $0x20] sm:$0xff]   ;;  %v860_v11 = vld [vmem:[%s1208_s14 + $0x28] sm:$0xff]   ;;  %v861_v12 = vld [vmem:[%s1208_s14 + $0x30] sm:$0xff]   ;;  %v510_v34 = vand.u32 127, %v509_v32  ;;  %p1333_p4 = scmp.ne.s32.totalorder %s1329_s15, 0 }
  0x4c   : > { %s1353_s27 = smov (!%p316_p12, %s685_s27), 3  ;;  %722 = vmatpush3.bf16.msra.mxu0 %v855_v2  ;;  %v862_v13 = vld [vmem:[%s1208_s14 + $0x38] sm:$0xff]   ;;  %s312_s14 = sand.u32 1, %s984_s19  }
  0x4d   : > { %723 = vmatprep.subr.bf16.mxu0 %v1026_v0  ;;  %s688_s6 = sshll.u32 %s1353_s27, 3  ;;  %s686_s12 = sshll.u32 %s1353_s27, 2 }
  0x4e   : > { %s325_s13 = scalar_lea.vmem %s1315_s2, %s688_s6  ;;  %s334_s29 = scalar_lea.vmem %s1317_s4, %s688_s6 }
  0x4f   : > { %s319_s1 = scalar_lea.vmem %s1313_s0, %s686_s12  ;;  %v451_v5 = vld [vmem:[%s325_s13] sm:$0xff]  ;;  %v452_v8 = vld [vmem:[%s325_s13 + $0x8] sm:$0xff]  ;;  %s684_s30 = sshll.u32 %s312_s14, 4 }
  0x50   : > { %724 = vmatpush3.bf16.msra.mxu0 %v856_v3  ;;  %v513_v6 = vld [vmem:[%s334_s29] sm:$0xff]  ;;  %455 = vperm.xlu0 %853, %v451_v5   ;;  %v514_v9 = vld [vmem:[%s334_s29 + $0x8] sm:$0xff]  ;;  %s328_s27 = scalar_select %p327_p7, %s1008_s25, 2 }
  0x51   : > { %725 = vmatprep.subr.bf16.mxu0 %v1026_v0  ;;  %516 = vperm.xlu1 %854, %v513_v6   ;;  %v863_v14 = vld [vmem:[%s319_s1] sm:$0xff]   ;;  %s705_s1 = sshll.u32 %s1008_s25, 7  ;;  %s741_s13 = smul.u32 6, %s1004_s24 }
  0x52   : > { %s329_s11 = scalar_lea.vmem %s1316_s3, %s328_s27  ;;  %v511_v35 = vstv %s705_s1  ;;  %s314_s8 = scalar_lea.vmem [#allocation5], %s684_s30 }
  0x53   : > { %v700_v17 = vld [vmem:[%s329_s11] ss:$0 sm:$0xff]  ;;  %v512_v42 = vadd.s32 %v511_v35, %v510_v34  ;;  %s542_s9 = sadd.s32 %s1008_s25, %s741_s13  ;;  %s545_s29 = sshll.u32 %s314_s8, 4  ;;  %s1243_s29 = int_to_ptr.vmem [resolvable:$true] %s545_s29 }
  0x54   : > { %726 = vmatpush3.bf16.msra.mxu0 %v857_v4  ;;  %460 = vperm.xlu0 %853, %v452_v8   ;;  %s709_s24 = sshll.u32 %s542_s9, 7  ;;  %s1252_s27 = scalar_lea.sflag [#allocation4], %s312_s14 }
  0x55   : > { %727 = vmatprep.subr.bf16.mxu0 %v1026_v0  ;;  %519 = vperm.xlu1 %854, %v514_v9   ;;  %s1248_s10 = scalar_lea.hbm %s1318_s5, %s709_s24  ;;  %s898_s6 = scalar_lea.vmem %s1243_s29, 256 }
  0x56   : > { %p899_p2 = scmp.ne.s32.totalorder %s1243_s29, %s898_s6  ;;  %s1029_s12 = smov [#allocation5]  }
  0x57   : > { %s902_s11 = sshll.u32 %s1029_s12, 4  ;;  %s903_s11 = int_to_ptr.vmem [resolvable:$false] %s902_s11 }
  0x58   : > { %728 = vmatpush3.bf16.msra.mxu0 %v858_v7  ;;  %p900_p0 = pnand %p899_p2, %p1333_p4  ;;  %s904_s1 = scalar_lea.vmem %s903_s11, 512 }
  0x59   : > { %729 = vmatprep.subr.bf16.mxu0 %v1026_v0  ;;  %p905_p5 = scmp.lt.s32.totalorder %s1243_s29, %s903_s11  ;;  %p906_p8 = scmp.lt.s32.totalorder %s904_s1, %s898_s6 }
  0x5a   : > { %p901_p1 = pneg %p900_p0 }
  0x5b   : > { %p907_p3 = por %p906_p8, %p905_p5 }
  0x5c   : > { %730 = vmatpush3.bf16.msra.mxu0 %v859_v10 }
  0x5d   : > { %731 = vmatprep.subr.bf16.mxu0 %v1026_v0  ;;  %p908_p10 = pnand %p907_p3, %p901_p1 }
  0x60   : > { %732 = vmatpush3.bf16.msra.mxu0 %v860_v11 }
  0x61   : > { %733 = vmatprep.subr.bf16.mxu0 %v1026_v0 }
  0x64   : > { %734 = vmatpush3.bf16.msra.mxu0 %v861_v12 }
  0x65   : > { %735 = vmatprep.subr.bf16.mxu0 %v1026_v0 }
  0x68   : > { %736 = vmatpush3.bf16.msra.mxu0 %v862_v13 }
  0x6b   : > { %738 = vmatmul.mubr.bf16.vlgmr.msra.gmra.mrb[0].mxu0 %v863_v14 }
  0xcf   : > { %v456_v15 = vpop.permute.xlu0 %455 }
  0xd0   : > { %v517_v38 = vpop.permute.xlu1 %516 }
  0xd1   : > { %vm521_vm6 = vcmp.eq.s32.totalorder %v512_v42, %v517_v38 }
  0xd3   : > { %v461_v20 = vpop.permute.xlu0 %460 }
  0xd4   : > { %v520_v53 = vpop.permute.xlu1 %519 }
  0xd5   : > { %vm522_vm8 = vcmp.eq.s32.totalorder %v512_v42, %v520_v53 }
 0x13e   : > { %v444_v16 = vpop.f32.mrb[0].mxu0 }
 0x13f   : > { %v463_v18 = vmul.f32 %v456_v15, %v444_v16  ;;  %v739_v19 = vpop.f32.mrb[1].mxu0 }
 0x140   : > { %v447_v21 = vpop.f32.mrb[2].mxu0 }
 0x141   : > { %v472_v22 = vmul.f32 %v700_v17, %v463_v18  ;;  %v464_v23 = vmul.f32 %v461_v20, %v447_v21  ;;  %v740_v24 = vpop.f32.mrb[3].mxu0 }
 0x143   : > { %v701_v25 = vclamps-f32 %v472_v22, 1.0  ;;  %v473_v26 = vmul.f32 %v700_v17, %v464_v23 }
 0x145   : > { %v478_v27 = vmul.f32 %v701_v25, %v701_v25  ;;  %v702_v28 = vclamps-f32 %v473_v26, 1.0  ;;  %v496_v45 = vmul.f32 0.87758255, %v701_v25  ;;  %v703_v50 = vadd.f32 -0.23971277, %v701_v25 }
 0x146   : > { %vm502_vm5 = vcmp.gt.f32.partialorder %v701_v25, -0.87758255 }
 0x147   : > { %v480_v29 = vsub.f32 1.0, %v478_v27  ;;  %v479_v30 = vmul.f32 %v702_v28, %v702_v28  ;;  %v497_v51 = vmul.f32 0.87758255, %v702_v28  ;;  %v704_v56 = vadd.f32 -0.23971277, %v702_v28 }
 0x148   : > { %vm503_vm7 = vcmp.gt.f32.partialorder %v702_v28, -0.87758255 }
 0x149   : > { %v481_v31 = vsub.f32 1.0, %v479_v30  ;;  %864 = vrsqrt.f32 %v480_v29  ;;  %vm484_vm1 = vcmp.eq.f32.partialorder %v480_v29, inf  ;;  %v487_v39 = vand.u32 2147483648, %v480_v29 }
 0x14a   : > { %vm486_vm2 = vcmp.eq.f32.partialorder %v480_v29, 0.0 }
 0x14b   : > { %866 = vrsqrt.f32 %v481_v31  ;;  %vm491_vm3 = vcmp.eq.f32.partialorder %v481_v31, inf  ;;  %v494_v44 = vand.u32 2147483648, %v481_v31  ;;  %vm493_vm4 = vcmp.eq.f32.partialorder %v481_v31, 0.0 }
 0x153   : > { %v865_v33 = vpop.eup %864 }
 0x154   : > { %v483_v36 = vmul.f32 %v865_v33, %v480_v29 }
 0x155   : > { %v867_v37 = vpop.eup %866 }
 0x156   : > { %v485_v40 = vsel %vm484_vm1, %v480_v29, %v483_v36  ;;  %v490_v41 = vmul.f32 %v867_v37, %v481_v31 }
 0x157   : > { %v488_v43 = vsel %vm486_vm2, %v487_v39, %v485_v40 }
 0x158   : > { %v498_v46 = vmul.f32 0.47942555, %v488_v43  ;;  %v492_v47 = vsel %vm491_vm3, %v481_v31, %v490_v41 }
 0x159   : > { %v495_v48 = vsel %vm493_vm4, %v494_v44, %v492_v47 }
 0x15a   : > { %v500_v49 = vsub.f32 %v496_v45, %v498_v46  ;;  %v499_v52 = vmul.f32 0.47942555, %v495_v48 }
 0x15c   : > { %v506_v54 = vsel %vm502_vm5, %v500_v49, %v703_v50  ;;  %v501_v55 = vsub.f32 %v497_v51, %v499_v52 }
 0x15d   : > { %v523_v57 = vsel %vm521_vm6, %v506_v54, %v701_v25 }
 0x15e   : > { %v525_v58 = vmul.f32 30.0, %v523_v57  ;;  %v507_v59 = vsel %vm503_vm7, %v501_v55, %v704_v56 }
 0x15f   : > { %v524_v60 = vsel %vm522_vm8, %v507_v59, %v702_v28 }
 0x160   : > { %527 = vst [vmem:[%s314_s8] sm:$0xff] %v525_v58  ;;  %v526_v61 = vmul.f32 30.0, %v524_v60 }
 0x162   : > { %528 = vst [vmem:[%s314_s8 + $0x8] sm:$0xff] %v526_v61 }
 0x163   : > { %911 = shalt.err (!%p908_p10)
}
 0x164   : > { %s912_s14 = scalar_lea.hbm %s1248_s10, 256  ;;  %s916_s9 = scalar_lea.hbm %s1318_s5, 1536 }
 0x165   : > { %p913_p11 = scmp.ne.s32.totalorder %s1248_s10, %s912_s14  ;;  %p917_p13 = scmp.lt.u32.totalorder %s1248_s10, %s1318_s5 }
 0x166   : > { %p918_p12 = scmp.lt.u32.totalorder %s916_s9, %s912_s14  ;;  %p920_p2 = scmp.lt.u32.totalorder %s912_s14, %s1248_s10 }
 0x167   : > { %p914_p6 = pnand %p913_p11, %p1333_p4 }
 0x168   : > { %p919_p7 = por %p918_p12, %p917_p13 }
 0x169   : > { %p915_p9 = pneg %p914_p6 }
 0x16a   : > { %p921_p0 = por %p920_p2, %p919_p7 }
 0x16c   : > { %p922_p1 = pnand %p921_p0, %p915_p9 }
 0x16e   : > { %925 = shalt.err (!%p922_p1)
}
 0x16f   : > { %s1030_s25 = smov 128   ;;  %s1031_s7 = smov 384  }
 0x170   : > { %s1032_s6 = smov 8  }
 0x171   : > { %744 = dma.vmem_to_hbm [thread:$0]  (%p1333_p4), %s1243_s29, 256, %s1248_s10, %s1252_s27, %s1030_s25, %s1031_s7, %s1032_s6  }
 0x172 PF: > { %p755_p5 = scmp.ge.s32.totalorder %s1020_s28, 2  ;;  %s560_s12 = sand.u32 1, %s980_s18  }
 0x173   : > { %p1334_p8 = scmp.ne.s32.totalorder %s1330_s21, 0  ;;  %s561_s11 = scalar_lea.sflag [#allocation4], %s560_s12 }
 0x175   : > { %p751_p3 = pnand %p755_p5, %p1334_p8 }
 0x177   : > { %975 = dma.done.wait (!%p751_p3), %s561_s11, 256  }
 0x178   : > { %977 = vsyncadd (!%p751_p3), %s561_s11, 4294967040  ;;  %s21_s28 = sadd.s32 1, %s1020_s28   ;;  %s1335_s25 = sld [smem:[#allocation8_spill]] }
 0x179   : > { %p18_p10 = scmp.ge.s32.totalorder %s21_s28, 8   ;;  %s1336_s15 = sld [smem:[#allocation9_spill]] }
 0x17a   : > { %s1337_s27 = sld [smem:[#allocation10_spill]]  ;;  %s1338_s18 = smov %s984_s19 }
 0x17b   : > { %s1339_s19 = smov %s988_s20  ;;  %s1340_s20 = smov %s1153_s17 }
 0x17c   : > { %s1341_s21 = smov %s996_s22  ;;  %s1342_s22 = smov %s1000_s23 }
 0x17d   : > { %s1343_s23 = smov %s1150_s16  ;;  %s1344_s24 = smov %s1012_s26 }
 0x17e   :  { %20 = sbr.rel (!%p18_p10) target bundleno = 11 (0xb), region = 97 }
 0x17f   : > { %s1345_s26 = smov %s1336_s15 }
 0x185   :  { %566 = vsyncpa [#allocation3], 1 }
 0x186   :  { %568 = vsyncpa [#allocation3 + $0x1], 1 }
 0x187   :  { %569 = vsyncpa [#allocation4], 1 }
 0x188   :  { %571 = vsyncpa [#allocation4 + $0x1], 1 }

</bundles_post_ra>
